<compile_context>
chip_gen: v5e
topology: v5e:2x2
jax: 0.10.0
libtpu: 0.0.40
codegen_flags: <defaults>
</compile_context>

<pallas_src>
import jax
import jax.numpy as jnp
from jax import lax
from jax.experimental import pallas as pl
from jax.experimental.pallas import tpu as pltpu

_LANE = 128
_SUBLANE = 8
_NEG = -1e30  # fill for padded vocab columns (exp(-1e30 - m) == 0 in f32)


def _round_up(x, m):
    return (x + m - 1) // m * m


def _gather_logits(ids, t0_ref, t1_ref, t2_ref, tn, vp):
    """One-hot @ (3-plane bf16 split of the f32 table) on the MXU."""
    col = lax.broadcasted_iota(jnp.int32, (tn, vp), 1)     # (TN, Vp)
    onehot = (col == ids).astype(jnp.bfloat16)             # exact 0/1 in bf16
    # Each dot selects exactly one bf16 row with f32 accumulation (exact);
    # hi + mid + lo reconstructs the f32 table value to ~1 ulp.
    logits = jnp.dot(onehot, t0_ref[...], preferred_element_type=jnp.float32)
    logits = logits + jnp.dot(onehot, t1_ref[...],
                              preferred_element_type=jnp.float32)
    logits = logits + jnp.dot(onehot, t2_ref[...],
                              preferred_element_type=jnp.float32)
    return col, logits


def _bigram_logits_kernel(idx_ref, t0_ref, t1_ref, t2_ref, logits_ref):
    # Inference path: embedding gather only.
    tn, vp = logits_ref.shape
    ids = idx_ref[...]                                     # (TN, 1) int32
    _, logits = _gather_logits(ids, t0_ref, t1_ref, t2_ref, tn, vp)
    logits_ref[...] = logits


def _bigram_train_kernel(idx_ref, tgt_ref, t0_ref, t1_ref, t2_ref,
                         logits_ref, ploss_ref):
    # Training path: gather + fused per-token cross-entropy.
    tn, vp = logits_ref.shape
    ids = idx_ref[...]                                     # (TN, 1) int32
    col, logits = _gather_logits(ids, t0_ref, t1_ref, t2_ref, tn, vp)
    logits_ref[...] = logits

    # Numerically stable log-softmax; padded vocab columns are ~-1e30 so their
    # exp() terms are exactly zero and the max comes from real columns.
    m = jnp.max(logits, axis=-1, keepdims=True)            # (TN, 1)
    lse = m + jnp.log(jnp.sum(jnp.exp(logits - m), axis=-1, keepdims=True))
    tgt = tgt_ref[...]                                      # (TN, 1) int32
    tgt_logit = jnp.sum(jnp.where(col == tgt, logits, 0.0),
                        axis=-1, keepdims=True)             # (TN, 1)
    ploss_ref[...] = lse - tgt_logit                        # per-token NLL


def _split_table(table, V, Vp):
    """Pad the (V, V) f32 table to (Vp, Vp) and split into 3 bf16 planes."""
    table_f = jnp.full((Vp, Vp), jnp.float32(_NEG))
    table_f = table_f.at[:V, :V].set(table.astype(jnp.float32))
    table_f = table_f.at[V:, :].set(0.0)          # rows >= V are never selected
    t0 = table_f.astype(jnp.bfloat16)
    r1 = table_f - t0.astype(jnp.float32)
    t1 = r1.astype(jnp.bfloat16)
    r2 = r1 - t1.astype(jnp.float32)
    t2 = r2.astype(jnp.bfloat16)
    return t0, t1, t2


def bigram_forward(idx, table, targets=None, *, tile_n=512):
    """Pallas implementation of BigramLanguageModel.forward.

    Returns (logits, loss):
      - targets is None: logits (B, T, V), loss None
      - else:            logits (B*T, V),  loss scalar mean cross-entropy
    """
    B, T = idx.shape
    V = table.shape[0]
    N = B * T
    Vp = _round_up(V, _LANE)

    # Adaptive token tiling: single grid step at toy sizes (per-step overhead
    # would dominate), 512-row tiles at realistic N.
    TN = _round_up(min(tile_n, _round_up(N, _SUBLANE)), _SUBLANE)
    N_pad = _round_up(N, TN)
    G = N_pad // TN

    t0, t1, t2 = _split_table(table, V, Vp)

    idx_p = jnp.zeros((N_pad, 1), jnp.int32).at[:N, 0].set(
        idx.reshape(-1).astype(jnp.int32))

    grid = (G,)
    tok_col_spec = pl.BlockSpec((TN, 1), lambda i: (i, 0))
    tbl_spec = pl.BlockSpec((Vp, Vp), lambda i: (0, 0))      # VMEM-resident
    logits_spec = pl.BlockSpec((TN, Vp), lambda i: (i, 0))   # lane-dense
    cparams = pltpu.CompilerParams(dimension_semantics=("parallel",))

    if targets is None:
        logits_p = pl.pallas_call(
            _bigram_logits_kernel,
            out_shape=jax.ShapeDtypeStruct((N_pad, Vp), jnp.float32),
            grid=grid,
            in_specs=[tok_col_spec, tbl_spec, tbl_spec, tbl_spec],
            out_specs=logits_spec,
            compiler_params=cparams,
        )(idx_p, t0, t1, t2)
        return logits_p[:N, :V].reshape(B, T, V), None

    tgt_p = jnp.zeros((N_pad, 1), jnp.int32).at[:N, 0].set(
        targets.reshape(-1).astype(jnp.int32))

    logits_p, per_tok = pl.pallas_call(
        _bigram_train_kernel,
        out_shape=(jax.ShapeDtypeStruct((N_pad, Vp), jnp.float32),
                   jax.ShapeDtypeStruct((N_pad, 1), jnp.float32)),
        grid=grid,
        in_specs=[tok_col_spec, tok_col_spec, tbl_spec, tbl_spec, tbl_spec],
        out_specs=(logits_spec, pl.BlockSpec((TN, 1), lambda i: (i, 0))),
        compiler_params=cparams,
    )(idx_p, tgt_p, t0, t1, t2)

    # Mean over the N real tokens only (padded rows never enter the loss).
    loss = jnp.sum(per_tok[:N, 0]) / jnp.float32(N)
    return logits_p[:N, :V], loss


if __name__ == "__main__":
    # Deterministic setup: tinyshakespeare char vocab size is 65.
    vocab_size = 65
    B, T = 2, 8

    key = jax.random.PRNGKey(0)
    k_table, k_idx, k_tgt = jax.random.split(key, 3)

    # nn.Embedding default init: N(0, 1).
    token_embedding_table = jax.random.normal(
        k_table, (vocab_size, vocab_size), dtype=jnp.float32)
    idx = jax.random.randint(k_idx, (B, T), 0, vocab_size, dtype=jnp.int32)
    targets = jax.random.randint(k_tgt, (B, T), 0, vocab_size, dtype=jnp.int32)

    # Path 1: training -> (B*T, V) logits + scalar loss.
    logits, loss = bigram_forward(idx, token_embedding_table, targets)
    jax.block_until_ready((logits, loss))

    # Path 2: inference (targets=None) -> (B, T, V) logits, loss is None.
    logits_inf, loss_inf = bigram_forward(idx, token_embedding_table, None)
    jax.block_until_ready(logits_inf)
    assert loss_inf is None

    # Reference: exact f32 embedding gather + cross-entropy (the 3-plane bf16
    # split in the kernel reconstructs the f32 table to ~1 ulp).
    ref_logits = token_embedding_table[idx.reshape(-1)]
    ref_lse = jax.nn.logsumexp(ref_logits, axis=-1)
    ref_tgt = jnp.take_along_axis(
        ref_logits, targets.reshape(-1, 1), axis=-1)[:, 0]
    ref_loss = jnp.mean(ref_lse - ref_tgt)

    assert logits.shape == (B * T, vocab_size)
    assert logits_inf.shape == (B, T, vocab_size)
    assert jnp.allclose(logits, ref_logits, atol=1e-5, rtol=1e-5)
    assert jnp.allclose(logits_inf.reshape(B * T, vocab_size), ref_logits,
                        atol=1e-5, rtol=1e-5)
    assert jnp.allclose(loss, ref_loss, atol=1e-4, rtol=1e-4)

    # TODO(synk): generate() uses torch.multinomial sampling in a host-side
    # Python loop; autoregressive sampling is glue code, not a Pallas hot path.
    print("KERNEL_OK")
</pallas_src>

<mosaic_0001>
module attributes {stable_mosaic.version = 11 : i64} {
  func.func @_bigram_train_kernel(%arg0: i32, %arg1: memref<16x1xi32, #tpu.memory_space<vmem>>, %arg2: memref<16x1xi32, #tpu.memory_space<vmem>>, %arg3: memref<128x128xbf16, #tpu.memory_space<vmem>>, %arg4: memref<128x128xbf16, #tpu.memory_space<vmem>>, %arg5: memref<128x128xbf16, #tpu.memory_space<vmem>>, %arg6: memref<16x128xf32, #tpu.memory_space<vmem>>, %arg7: memref<16x1xf32, #tpu.memory_space<vmem>>) attributes {dimension_semantics = [#tpu.dimension_semantics<parallel>], iteration_bounds = array<i64: 1>, scalar_prefetch = 0 : i64, scratch_operands = 0 : i64, tpu.core_type = #tpu.core_type<tc>, window_params = [{transform_indices = @transform_0, window_bounds = array<i64: 16, 1>}, {transform_indices = @transform_1, window_bounds = array<i64: 16, 1>}, {pipeline_mode = #tpu.pipeline_mode<synchronous>, transform_indices = @transform_2, window_bounds = array<i64: 128, 128>}, {pipeline_mode = #tpu.pipeline_mode<synchronous>, transform_indices = @transform_3, window_bounds = array<i64: 128, 128>}, {pipeline_mode = #tpu.pipeline_mode<synchronous>, transform_indices = @transform_4, window_bounds = array<i64: 128, 128>}, {transform_indices = @transform_5, window_bounds = array<i64: 16, 128>}, {transform_indices = @transform_6, window_bounds = array<i64: 16, 1>}]} {
    %c0 = arith.constant 0 : index
    %c0_0 = arith.constant 0 : index
    %0 = vector.load %arg1[%c0, %c0_0] : memref<16x1xi32, #tpu.memory_space<vmem>>, vector<16x1xi32>
    %1 = tpu.iota {dimensions = array<i32: 1>} : vector<16x128xi32>
    %2 = vector.broadcast %0 : vector<16x1xi32> to vector<16x128xi32>
    %3 = arith.cmpi eq, %1, %2 : vector<16x128xi32>
    %4 = arith.extui %3 : vector<16x128xi1> to vector<16x128xi32>
    %5 = arith.sitofp %4 : vector<16x128xi32> to vector<16x128xf32>
    %6 = arith.truncf %5 : vector<16x128xf32> to vector<16x128xbf16>
    %c0_1 = arith.constant 0 : index
    %c0_2 = arith.constant 0 : index
    %7 = vector.load %arg3[%c0_1, %c0_2] : memref<128x128xbf16, #tpu.memory_space<vmem>>, vector<128x128xbf16>
    %cst = arith.constant dense<0.000000e+00> : vector<16x128xf32>
    %8 = tpu.matmul %6, %7, %cst {dimension_numbers = #tpu.dot_dimension_numbers<[1], [0], [0], [1], [0, 0, 1, 1], [], []>} : vector<16x128xbf16>, vector<128x128xbf16>, vector<16x128xf32> -> vector<16x128xf32>
    %c0_3 = arith.constant 0 : index
    %c0_4 = arith.constant 0 : index
    %9 = vector.load %arg4[%c0_3, %c0_4] : memref<128x128xbf16, #tpu.memory_space<vmem>>, vector<128x128xbf16>
    %cst_5 = arith.constant dense<0.000000e+00> : vector<16x128xf32>
    %10 = tpu.matmul %6, %9, %cst_5 {dimension_numbers = #tpu.dot_dimension_numbers<[1], [0], [0], [1], [0, 0, 1, 1], [], []>} : vector<16x128xbf16>, vector<128x128xbf16>, vector<16x128xf32> -> vector<16x128xf32>
    %11 = arith.addf %8, %10 : vector<16x128xf32>
    %c0_6 = arith.constant 0 : index
    %c0_7 = arith.constant 0 : index
    %12 = vector.load %arg5[%c0_6, %c0_7] : memref<128x128xbf16, #tpu.memory_space<vmem>>, vector<128x128xbf16>
    %cst_8 = arith.constant dense<0.000000e+00> : vector<16x128xf32>
    %13 = tpu.matmul %6, %12, %cst_8 {dimension_numbers = #tpu.dot_dimension_numbers<[1], [0], [0], [1], [0, 0, 1, 1], [], []>} : vector<16x128xbf16>, vector<128x128xbf16>, vector<16x128xf32> -> vector<16x128xf32>
    %14 = arith.addf %11, %13 : vector<16x128xf32>
    %c0_9 = arith.constant 0 : index
    %c0_10 = arith.constant 0 : index
    %15 = vector.load %arg6[%c0_9, %c0_10] : memref<16x128xf32, #tpu.memory_space<vmem>>, vector<16x128xf32>
    tpu.vector_store %arg6[%c0_9, %c0_10], %14 {strides = array<i32>} : memref<16x128xf32, #tpu.memory_space<vmem>>, vector<16x128xf32>,
    %cst_11 = arith.constant dense<0xFF800000> : vector<16xf32>
    %16 = vector.multi_reduction <maximumf>, %14, %cst_11 [1] : vector<16x128xf32> to vector<16xf32>
    %17 = vector.shape_cast %16 : vector<16xf32> to vector<16x1xf32>
    %18 = vector.broadcast %17 : vector<16x1xf32> to vector<16x128xf32>
    %19 = arith.subf %14, %18 : vector<16x128xf32>
    %20 = math.exp %19 : vector<16x128xf32>
    %cst_12 = arith.constant dense<0.000000e+00> : vector<16xf32>
    %21 = vector.multi_reduction <add>, %20, %cst_12 [1] : vector<16x128xf32> to vector<16xf32>
    %22 = vector.shape_cast %21 : vector<16xf32> to vector<16x1xf32>
    %23 = math.log %22 : vector<16x1xf32>
    %24 = arith.addf %17, %23 : vector<16x1xf32>
    %c0_13 = arith.constant 0 : index
    %c0_14 = arith.constant 0 : index
    %25 = vector.load %arg2[%c0_13, %c0_14] : memref<16x1xi32, #tpu.memory_space<vmem>>, vector<16x1xi32>
    %26 = vector.broadcast %25 : vector<16x1xi32> to vector<16x128xi32>
    %27 = arith.cmpi eq, %1, %26 : vector<16x128xi32>
    %cst_15 = arith.constant 0.000000e+00 : f32
    %28 = vector.broadcast %cst_15 : f32 to vector<16x128xf32>
    %29 = arith.select %27, %14, %28 : vector<16x128xi1>, vector<16x128xf32>
    %cst_16 = arith.constant dense<0.000000e+00> : vector<16xf32>
    %30 = vector.multi_reduction <add>, %29, %cst_16 [1] : vector<16x128xf32> to vector<16xf32>
    %31 = vector.shape_cast %30 : vector<16xf32> to vector<16x1xf32>
    %32 = arith.subf %24, %31 : vector<16x1xf32>
    %c0_17 = arith.constant 0 : index
    %c0_18 = arith.constant 0 : index
    %33 = vector.load %arg7[%c0_17, %c0_18] : memref<16x1xf32, #tpu.memory_space<vmem>>, vector<16x1xf32>
    tpu.vector_store %arg7[%c0_17, %c0_18], %32 {strides = array<i32>} : memref<16x1xf32, #tpu.memory_space<vmem>>, vector<16x1xf32>,
    return
  }
  func.func @transform_0(%arg0: i32) -> (i32, i32) {
    %c0_i32 = arith.constant 0 : i32
    %c0_i32_0 = arith.constant 0 : i32
    return %arg0, %c0_i32 : i32, i32
  }
  func.func @transform_1(%arg0: i32) -> (i32, i32) {
    %c0_i32 = arith.constant 0 : i32
    %c0_i32_0 = arith.constant 0 : i32
    return %arg0, %c0_i32 : i32, i32
  }
  func.func @transform_2(%arg0: i32) -> (i32, i32) {
    %c0_i32 = arith.constant 0 : i32
    %c0_i32_0 = arith.constant 0 : i32
    %c0_i32_1 = arith.constant 0 : i32
    return %c0_i32, %c0_i32_0 : i32, i32
  }
  func.func @transform_3(%arg0: i32) -> (i32, i32) {
    %c0_i32 = arith.constant 0 : i32
    %c0_i32_0 = arith.constant 0 : i32
    %c0_i32_1 = arith.constant 0 : i32
    return %c0_i32, %c0_i32_0 : i32, i32
  }
  func.func @transform_4(%arg0: i32) -> (i32, i32) {
    %c0_i32 = arith.constant 0 : i32
    %c0_i32_0 = arith.constant 0 : i32
    %c0_i32_1 = arith.constant 0 : i32
    return %c0_i32, %c0_i32_0 : i32, i32
  }
  func.func @transform_5(%arg0: i32) -> (i32, i32) {
    %c0_i32 = arith.constant 0 : i32
    %c0_i32_0 = arith.constant 0 : i32
    return %arg0, %c0_i32 : i32, i32
  }
  func.func @transform_6(%arg0: i32) -> (i32, i32) {
    %c0_i32 = arith.constant 0 : i32
    %c0_i32_0 = arith.constant 0 : i32
    return %arg0, %c0_i32 : i32, i32
  }
}

</mosaic_0001>

<bundles_post_ra>
// kernel: tpu_custom_call.1
= control target key start
LH: loop header
LB: loop body
LE: loop exit
PB: predicated region body
PF: predicated region fallthrough
CT: control target
= control target key end

     0   :  { %12 = vsyncpa [#allocation3], 0  ;;  %s715_s0 = inlined_call_operand.vmem [shape: s32[16,1], index: 0, kind: input, shape index: {}]   ;;  %s716_s1 = inlined_call_operand.vmem [shape: s32[16,1], index: 1, kind: input, shape index: {}]   ;;  %s717_s2 = inlined_call_operand.hbm [shape: bf16[128,128], index: 2, kind: input, shape index: {}]   ;;  %s718_s3 = inlined_call_operand.hbm [shape: bf16[128,128], index: 3, kind: input, shape index: {}]   ;;  %s719_s4 = inlined_call_operand.hbm [shape: bf16[128,128], index: 4, kind: input, shape index: {}]   ;;  %s720_s5 = inlined_call_operand.hbm [shape: f32[16,128], index: 5, kind: output, shape index: {0}]   ;;  %s721_s6 = inlined_call_operand.vmem [shape: f32[16,1], index: 6, kind: output, shape index: {1}]  }
   0x1   :  { %13 = vsyncpa [#allocation6], 0 }
   0x2   :  { %14 = vsyncpa [#allocation4], 0  ;;  %s36_s23 = sshll.u32 %s718_s3, 4  ;;  %s640_s24 = smov [#allocation5]   ;;  %s37_s23 = int_to_ptr.hbm [resolvable:$true] %s36_s23 }
   0x3   :  { %s38_s25 = sshll.u32 %s640_s24, 4  ;;  %s23_s28 = sshll.u32 %s717_s2, 4  ;;  %s39_s25 = int_to_ptr.vmem [resolvable:$true] %s38_s25  ;;  %s24_s28 = int_to_ptr.hbm [resolvable:$true] %s23_s28 }
   0x4   :  { %s641_s29 = smov 64   ;;  %s642_s30 = smov 4  }
   0x5   :  { %44 = dma.hbm_to_vmem [thread:$0]  %s37_s23, 1024, %s39_s25, [#allocation6], %s641_s29, %s641_s29, %s642_s30  }
   0x6   :  { %s643_s7 = smov [#allocation2]   ;;  %s49_s11 = sshll.u32 %s719_s4, 4  ;;  %s50_s11 = int_to_ptr.hbm [resolvable:$true] %s49_s11 }
   0x7   :  { %s25_s8 = sshll.u32 %s643_s7, 4  ;;  %s644_s3 = smov [#allocation7]   ;;  %s26_s8 = int_to_ptr.vmem [resolvable:$true] %s25_s8 }
   0x8   :  { %31 = dma.hbm_to_vmem [thread:$0]  %s24_s28, 1024, %s26_s8, [#allocation3], %s641_s29, %s641_s29, %s642_s30  }
   0x9   :  { %s51_s12 = sshll.u32 %s644_s3, 4  ;;  %s52_s12 = int_to_ptr.vmem [resolvable:$true] %s51_s12 }
   0xa   :  { %57 = dma.hbm_to_vmem [thread:$0]  %s50_s11, 1024, %s52_s12, [#allocation6], %s641_s29, %s641_s29, %s642_s30  }
   0xb   :  { %634 = dma.done.wait [#allocation3], 1024  }
   0xc   :  { %635 = vsyncadd [#allocation3], 4294966272 }
   0xd   :  { %636 = dma.done.wait [#allocation6], 2048  }
   0xe   :  { %637 = vsyncadd [#allocation6], 4294965248  ;;  %v645_v0 = vmov 0   ;;  %v70_v1 = vld [vmem:[%s715_s0] sm:$0xff]  ;;  %v509_v2 = vld [vmem:[#allocation5 + $0x38] sm:$0xff]  ;;  %v72_v30 = vlaneseq  ;;  %s372_s21 = sshll.u32 %s720_s5, 4  ;;  %s373_s21 = int_to_ptr.hbm [resolvable:$true] %s372_s21 }
   0xf   :  { %528 = vset.pattern.permute.xlu0 %v645_v0  ;;  %529 = vset.pattern.permute.xlu2 %v645_v0  ;;  %v501_v3 = vld [vmem:[#allocation2 + $0x38] sm:$0xff]  ;;  %v508_v5 = vld [vmem:[#allocation5 + $0x30] sm:$0xff]  ;;  %v71_v8 = vld [vmem:[%s715_s0 + $0x8] sm:$0xff]  ;;  %v646_v33 = vmov 1.0|1.0   ;;  %s648_s22 = smov 128  }
  0x10   :  { %75 = vperm.xlu0 %528, %v70_v1   ;;  %v517_v4 = vld [vmem:[#allocation7 + $0x38] sm:$0xff]  ;;  %167 = vmatpush.bf16.msra.mxu0 %v509_v2  ;;  %v500_v6 = vld [vmem:[#allocation2 + $0x30] sm:$0xff]  ;;  %v507_v9 = vld [vmem:[#allocation5 + $0x28] sm:$0xff]  ;;  %v73_v31 = vand.u32 127, %v72_v30  ;;  %s649_s23 = smov 8   ;;  %vm363_vm5 = vcmask 7168  }
  0x11   :  { %229 = vmatpush.bf16.msra.mxu1 %v501_v3  ;;  %307 = vmatpush.bf16.msra.mxu2 %v517_v4  ;;  %v516_v7 = vld [vmem:[#allocation7 + $0x30] sm:$0xff]  ;;  %v499_v10 = vld [vmem:[#allocation2 + $0x28] sm:$0xff]  ;;  %v506_v12 = vld [vmem:[#allocation5 + $0x20] sm:$0xff] }
  0x12   :  { %v515_v11 = vld [vmem:[#allocation7 + $0x28] sm:$0xff]  ;;  %v498_v13 = vld [vmem:[#allocation2 + $0x20] sm:$0xff]  ;;  %v505_v15 = vld [vmem:[#allocation5 + $0x18] sm:$0xff] }
  0x13   :  { %v514_v14 = vld [vmem:[#allocation7 + $0x20] sm:$0xff]  ;;  %v497_v16 = vld [vmem:[#allocation2 + $0x18] sm:$0xff]  ;;  %v504_v18 = vld [vmem:[#allocation5 + $0x10] sm:$0xff] }
  0x14   :  { %168 = vmatpush.bf16.msra.mxu0 %v508_v5  ;;  %v513_v17 = vld [vmem:[#allocation7 + $0x18] sm:$0xff]  ;;  %v496_v19 = vld [vmem:[#allocation2 + $0x10] sm:$0xff]  ;;  %v503_v21 = vld [vmem:[#allocation5 + $0x8] sm:$0xff] }
  0x15   :  { %230 = vmatpush.bf16.msra.mxu1 %v500_v6  ;;  %308 = vmatpush.bf16.msra.mxu2 %v516_v7  ;;  %v512_v20 = vld [vmem:[#allocation7 + $0x10] sm:$0xff]  ;;  %v495_v22 = vld [vmem:[#allocation2 + $0x8] sm:$0xff]  ;;  %v502_v24 = vld [vmem:[#allocation5] sm:$0xff] }
  0x16   :  { %v511_v23 = vld [vmem:[#allocation7 + $0x8] sm:$0xff]  ;;  %v494_v25 = vld [vmem:[#allocation2] sm:$0xff] }
  0x17   :  { %v510_v26 = vld [vmem:[#allocation7] sm:$0xff]  ;;  %v346_v28 = vld [vmem:[%s716_s1 + $0x8] sm:$0xff] }
  0x18   :  { %78 = vperm.xlu0 %528, %v71_v8   ;;  %169 = vmatpush.bf16.msra.mxu0 %v507_v9  ;;  %v345_v27 = vld [vmem:[%s716_s1] sm:$0xff]  ;;  %s647_s1 = smov [#allocation8]  }
  0x19   :  { %231 = vmatpush.bf16.msra.mxu1 %v499_v10  ;;  %309 = vmatpush.bf16.msra.mxu2 %v515_v11  ;;  %s370_s18 = sshll.u32 %s647_s1, 4  ;;  %s371_s18 = int_to_ptr.vmem [resolvable:$true] %s370_s18 }
  0x1a   :  { %348 = vperm.xlu2 %529, %v345_v27  }
  0x1c   :  { %170 = vmatpush.bf16.msra.mxu0 %v506_v12 }
  0x1d   :  { %232 = vmatpush.bf16.msra.mxu1 %v498_v13  ;;  %310 = vmatpush.bf16.msra.mxu2 %v514_v14 }
  0x20   :  { %171 = vmatpush.bf16.msra.mxu0 %v505_v15 }
  0x21   :  { %233 = vmatpush.bf16.msra.mxu1 %v497_v16  ;;  %311 = vmatpush.bf16.msra.mxu2 %v513_v17 }
  0x22   :  { %351 = vperm.xlu2 %529, %v346_v28  }
  0x24   :  { %172 = vmatpush.bf16.msra.mxu0 %v504_v18 }
  0x25   :  { %234 = vmatpush.bf16.msra.mxu1 %v496_v19  ;;  %312 = vmatpush.bf16.msra.mxu2 %v512_v20 }
  0x28   :  { %173 = vmatpush.bf16.msra.mxu0 %v503_v21 }
  0x29   :  { %235 = vmatpush.bf16.msra.mxu1 %v495_v22  ;;  %313 = vmatpush.bf16.msra.mxu2 %v511_v23 }
  0x2c   :  { %174 = vmatpush.bf16.msra.mxu0 %v502_v24 }
  0x2d   :  { %236 = vmatpush.bf16.msra.mxu1 %v494_v25  ;;  %314 = vmatpush.bf16.msra.mxu2 %v510_v26 }
  0x74   :  { %v349_v36 = vpop.permute.xlu2 %348 }
  0x75   :  { %vm353_vm3 = vcmp.eq.s32.totalorder %v73_v31, %v349_v36 }
  0x7c   :  { %v352_v54 = vpop.permute.xlu2 %351 }
  0x7d   :  { %vm354_vm4 = vcmp.eq.s32.totalorder %v73_v31, %v352_v54 }
  0x82   :  { %v76_v29 = vpop.permute.xlu0 %75 }
  0x83   :  { %vm80_vm0 = vcmp.eq.s32.totalorder %v73_v31, %v76_v29 }
  0x8a   :  { %v79_v32 = vpop.permute.xlu0 %78 }
  0x8b   :  { %vm81_vm1 = vcmp.eq.s32.totalorder %v73_v31, %v79_v32 }
  0x8c   :  { %vm424_vm2 = vmpackc.low %vm81_vm1, %vm80_vm0 }
  0x8d   :  { %425 = vmatmul.msk.bf16.vlgmr.msra.gmra.mxu0 %vm424_vm2, %v646_v33  ;;  %459 = vmatmul.msk.bf16.vlgmr.msra.gmra.mxu1 %vm424_vm2, %v646_v33 }
  0x8e   :  { %493 = vmatmul.msk.bf16.vlgmr.msra.gmra.mxu2 %vm424_vm2, %v646_v33 }
 0x10a   :  { %v176_v34 = vpop.f32.mrf.mxu0  ;;  %v238_v35 = vpop.f32.mrf.mxu1 }
 0x10b   :  { %v239_v37 = vadd.f32 %v238_v35, %v176_v34 }
 0x111   :  { %v316_v38 = vpop.f32.mrf.mxu2 }
 0x112   :  { %v321_v39 = vadd.f32 %v316_v38, %v239_v37  ;;  %v178_v41 = vpop.f32.mrf.mxu0  ;;  %v240_v42 = vpop.f32.mrf.mxu1 }
 0x113   :  { %v241_v43 = vadd.f32 %v240_v42, %v178_v41 }
 0x114   :  { %323 = vst [vmem:[#allocation8] sm:$0xff] %v321_v39  ;;  %325 = vmax.xlane.f32.xlu1 %v321_v39  ;;  %v355_v40 = vsel %vm353_vm3, %v321_v39, 0.0 }
 0x115   :  { %357 = vadd.xlane.f32.xlu2 %v355_v40 }
 0x119   :  { %v318_v44 = vpop.f32.mrf.mxu2 }
 0x11a   :  { %v322_v45 = vadd.f32 %v318_v44, %v241_v43 }
 0x11c   :  { %324 = vst [vmem:[#allocation8 + $0x8] sm:$0xff] %v322_v45  ;;  %327 = vmax.xlane.f32.xlu1 %v322_v45  ;;  %v356_v55 = vsel %vm354_vm4, %v322_v45, 0.0 }
 0x11d   :  { %378 = dma.vmem_to_hbm [thread:$0]  %s371_s18, 256, %s373_s21, [#allocation4], %s648_s22, %s648_s22, %s649_s23  }
 0x187   :  { %v326_v46 = vpop.xlane.xlu1 %325 }
 0x188   :  { %v329_v47 = vsub.f32 %v321_v39, %v326_v46  ;;  %v358_v61 = vpop.xlane.xlu2 %357 }
 0x18a   :  { %v331_v48 = vmul.f32 1.442695, %v329_v47 }
 0x18c   :  { %530 = vpow2.f32 %v331_v48 }
 0x18f   :  { %v328_v49 = vpop.xlane.xlu1 %327 }
 0x190   :  { %v330_v50 = vsub.f32 %v322_v45, %v328_v49 }
 0x192   :  { %v531_v51 = vpop.eup %530  ;;  %v333_v52 = vmul.f32 1.442695, %v330_v50 }
 0x193   :  { %335 = vadd.xlane.f32.xlu0 %v531_v51 }
 0x194   :  { %532 = vpow2.f32 %v333_v52 }
 0x19a   :  { %v533_v53 = vpop.eup %532 }
 0x19b   :  { %337 = vadd.xlane.f32.xlu1 %v533_v53 }
 0x1a3   :  { %359 = vadd.xlane.f32.xlu1 %v356_v55 }
 0x206   :  { %v336_v56 = vpop.xlane.xlu0 %335 }
 0x207   :  { %534 = vlog2.f32 %v336_v56 }
 0x20d   :  { %v535_v57 = vpop.eup %534 }
 0x20e   :  { %v340_v58 = vmul.f32 0.6931472, %v535_v57  ;;  %v338_v59 = vpop.xlane.xlu1 %337 }
 0x20f   :  { %536 = vlog2.f32 %v338_v59 }
 0x210   :  { %v343_v60 = vadd.f32 %v340_v58, %v326_v46 }
 0x212   :  { %v361_v62 = vsub.f32 %v343_v60, %v358_v61 }
 0x214   :  { %364 = vst.msk [vmem:[%s721_s6] sm:$0xff] %vm363_vm5, %v361_v62 }
 0x215   :  { %v537_v63 = vpop.eup %536 }
 0x216   :  { %v342_v0 = vmul.f32 0.6931472, %v537_v63  ;;  %v360_v2 = vpop.xlane.xlu1 %359 }
 0x218   :  { %v344_v1 = vadd.f32 %v342_v0, %v328_v49 }
 0x21a   :  { %v362_v3 = vsub.f32 %v344_v1, %v360_v2 }
 0x21c   :  { %365 = vst.msk [vmem:[%s721_s6 + $0x8] sm:$0xff] %vm363_vm5, %v362_v3 }
 0x21d   :  { %638 = dma.done.wait [#allocation4], 256  }
 0x21e   :  { %639 = vsyncadd [#allocation4], 4294967040 }
 0x21f   :  { %387 = vsyncpa [#allocation3], 1 }
 0x220   :  { %388 = vsyncpa [#allocation6], 1 }
 0x221   :  { %389 = vsyncpa [#allocation4], 1 }

</bundles_post_ra>
